<compile_context>
chip_gen: v6e
topology: v6e:2x2x1
jax: 0.10.0
libtpu: 0.0.40
codegen_flags: <defaults>
</compile_context>

<pallas_src>
import numpy as np
import jax
import jax.numpy as jnp
from jax.experimental import pallas as pl
from jax.experimental.pallas import tpu as pltpu


# ----------------------------------------------------------------------------
# Fixed geometry of the model (Connect-4 board)
# ----------------------------------------------------------------------------
ROWS, COLS = 6, 7
IN_FEATS = ROWS * COLS                                   # 42
C1, K1, P1 = 32, 5, 1
H1, W1 = ROWS + 2 * P1 - K1 + 1, COLS + 2 * P1 - K1 + 1  # 4, 5
N1 = H1 * W1 * C1                                        # 640 = 5 * 128 (lane dense)
C2, K2 = 64, 3
H2, W2 = H1 - K2 + 1, W1 - K2 + 1                        # 2, 3
N2 = H2 * W2 * C2                                        # 384 = 3 * 128 (lane dense)
N_OUT = COLS                                             # 7
N_OUT_PAD = 128                                          # pad FC outputs to one lane tile


def _round_up(n, m):
    return ((n + m - 1) // m) * m


def _cdiv(a, b):
    return (a + b - 1) // b


# ----------------------------------------------------------------------------
# Fused Pallas kernel: whole forward pass for one batch tile
# ----------------------------------------------------------------------------
def fused_forward_kernel(x_ref, m1_ref, b1_ref, m2_ref, b2_ref,
                         wfc_ref, bfc_ref, o_ref):
    # bf16 operands on the MXU, f32 accumulation; bias + ReLU in f32 on the VPU.
    x = x_ref[...]                                                       # (BT, 42) bf16

    # Conv2d(1, 32, 5, padding=1) + ReLU   (lowered to one dense matmul)
    h1 = jnp.dot(x, m1_ref[...], preferred_element_type=jnp.float32)
    h1 = jnp.maximum(h1 + b1_ref[...], 0.0).astype(jnp.bfloat16)         # (BT, 640)

    # Conv2d(32, 64, 3) + ReLU             (lowered to one dense matmul)
    h2 = jnp.dot(h1, m2_ref[...], preferred_element_type=jnp.float32)
    h2 = jnp.maximum(h2 + b2_ref[...], 0.0).astype(jnp.bfloat16)         # (BT, 384)

    # Linear(384, 7)  (columns permuted to our layout, padded to 128 lanes)
    out = jnp.dot(h2, wfc_ref[...], preferred_element_type=jnp.float32)
    o_ref[...] = (out + bfc_ref[...]).astype(o_ref.dtype)                # (BT, 128) bf16


# ----------------------------------------------------------------------------
# One-time weight lowering (outside jit): PyTorch layout -> kernel layout
# ----------------------------------------------------------------------------
def prepare_params(params):
    """Lower conv weights to dense matrices over the fixed 6x7 board.

    Activation layouts inside the kernel are position-major / channel-minor:
      h1[b, p1*32 + c1]   p1 = oh1*5 + ow1  over the 4x5 conv1 grid
      h2[b, p2*64 + c2]   p2 = oh2*3 + ow2  over the 2x3 conv2 grid
    Matmul operands are cast to bf16 here (once); biases stay f32.
    """
    w1 = np.asarray(params["w1"], np.float32)     # (32, 1, 5, 5)
    b1 = np.asarray(params["b1"], np.float32)     # (32,)
    w2 = np.asarray(params["w2"], np.float32)     # (64, 32, 3, 3)
    b2 = np.asarray(params["b2"], np.float32)     # (64,)
    wfc = np.asarray(params["wfc"], np.float32)   # (7, 384)
    bfc = np.asarray(params["bfc"], np.float32)   # (7,)

    # Conv1 (padding=1) as matmul on the flattened (6*7) board.
    M1 = np.zeros((IN_FEATS, N1), np.float32)
    for oh in range(H1):
        for ow in range(W1):
            p = oh * W1 + ow
            for i in range(K1):
                for j in range(K1):
                    h, w = oh + i - P1, ow + j - P1
                    if 0 <= h < ROWS and 0 <= w < COLS:
                        M1[h * COLS + w, p * C1:(p + 1) * C1] = w1[:, 0, i, j]
    B1 = np.tile(b1, H1 * W1)[None, :]            # (1, 640), layout [p1*32 + c1]

    # Conv2 (no padding) as matmul on the (p1, c1) conv1 activations.
    M2 = np.zeros((N1, N2), np.float32)
    for oh2 in range(H2):
        for ow2 in range(W2):
            p2 = oh2 * W2 + ow2
            for i in range(K2):
                for j in range(K2):
                    p1 = (oh2 + i) * W1 + (ow2 + j)
                    # M2[p1*32 + c1, p2*64 + c2] = w2[c2, c1, i, j]
                    M2[p1 * C1:(p1 + 1) * C1, p2 * C2:(p2 + 1) * C2] = w2[:, :, i, j].T
    B2 = np.tile(b2, H2 * W2)[None, :]            # (1, 384), layout [p2*64 + c2]

    # FC: permute columns from PyTorch's (c2, h, w) flatten order to our
    # (p2, c2) layout, and pad the 7 outputs to 128 lanes (lane-dense store).
    WFC = np.zeros((N2, N_OUT_PAD), np.float32)
    for p2 in range(H2 * W2):
        for c2 in range(C2):
            WFC[p2 * C2 + c2, :N_OUT] = wfc[:, c2 * (H2 * W2) + p2]
    BFC = np.zeros((1, N_OUT_PAD), np.float32)
    BFC[0, :N_OUT] = bfc

    return {
        "M1": jnp.asarray(M1, jnp.bfloat16),
        "B1": jnp.asarray(B1, jnp.float32),
        "M2": jnp.asarray(M2, jnp.bfloat16),
        "B2": jnp.asarray(B2, jnp.float32),
        "WFC": jnp.asarray(WFC, jnp.bfloat16),
        "BFC": jnp.asarray(BFC, jnp.float32),
    }


# ----------------------------------------------------------------------------
# Forward pass (single fused pallas_call, batch-tiled grid)
# ----------------------------------------------------------------------------
def conv_model_forward(state, prep, *, batch_tile=1024):
    """state: (B, 6, 7) -> logits (B, 7) float32."""
    B = state.shape[0]
    x2d = state.reshape(B, IN_FEATS).astype(jnp.bfloat16)

    # Padding-aware, TC-parity-aware batch tiling:
    #  * pick the tile COUNT first (forced even when >1 so v7x's two
    #    TensorCores both get work under dimension_semantics=("parallel",)),
    #  * then balance the tile SIZE so batch padding stays <16 rows per tile,
    #  * tile rows are a multiple of 16 (bf16 sublane packing).
    n_tiles = max(1, _cdiv(B, batch_tile))
    if n_tiles > 1 and n_tiles % 2 == 1:
        n_tiles += 1
    bt = _round_up(max(_cdiv(B, n_tiles), 1), 16)
    Bp = bt * n_tiles
    if Bp != B:
        x2d = jnp.pad(x2d, ((0, Bp - B), (0, 0)))
    grid = (n_tiles,)

    flops = 2 * Bp * (IN_FEATS * N1 + N1 * N2 + N2 * N_OUT_PAD)
    bytes_accessed = (2 * Bp * (IN_FEATS + N_OUT_PAD)                    # bf16 I/O
                      + 2 * (IN_FEATS * N1 + N1 * N2 + N2 * N_OUT_PAD)   # bf16 weights
                      + 4 * (N1 + N2 + N_OUT_PAD))                       # f32 biases

    out = pl.pallas_call(
        fused_forward_kernel,
        out_shape=jax.ShapeDtypeStruct((Bp, N_OUT_PAD), jnp.bfloat16),
        grid_spec=pltpu.PrefetchScalarGridSpec(
            num_scalar_prefetch=0,
            grid=grid,
            in_specs=[
                pl.BlockSpec((bt, IN_FEATS), lambda i: (i, 0)),       # boards (tiled, bf16)
                pl.BlockSpec((IN_FEATS, N1), lambda i: (0, 0)),       # conv1 matrix (bf16)
                pl.BlockSpec((1, N1), lambda i: (0, 0)),              # conv1 bias (f32)
                pl.BlockSpec((N1, N2), lambda i: (0, 0)),             # conv2 matrix (bf16)
                pl.BlockSpec((1, N2), lambda i: (0, 0)),              # conv2 bias (f32)
                pl.BlockSpec((N2, N_OUT_PAD), lambda i: (0, 0)),      # fc weight (bf16, padded)
                pl.BlockSpec((1, N_OUT_PAD), lambda i: (0, 0)),       # fc bias (f32, padded)
            ],
            out_specs=pl.BlockSpec((bt, N_OUT_PAD), lambda i: (i, 0)),
        ),
        compiler_params=pltpu.CompilerParams(
            dimension_semantics=("parallel",),      # shard batch tiles across TCs (v7x)
            vmem_limit_bytes=48 * 1024 * 1024,      # safe for bt<=2048 on v5e/v6e/v7x
        ),
        cost_estimate=pl.CostEstimate(
            flops=flops, transcendentals=0, bytes_accessed=bytes_accessed),
    )(x2d, prep["M1"], prep["B1"], prep["M2"], prep["B2"], prep["WFC"], prep["BFC"])

    # Slice off batch padding and the 121 padded output lanes; return f32 logits.
    return out[:B, :N_OUT].astype(jnp.float32)


# ----------------------------------------------------------------------------
# Parameter init (PyTorch layouts, as in ConvolutionalModel.__init__)
# ----------------------------------------------------------------------------
def init_params(key):
    k1, k2, k3, k4, k5, k6 = jax.random.split(key, 6)
    return {
        "w1":  jax.random.normal(k1, (C1, 1, K1, K1), jnp.float32) * 0.1,    # Conv2d(1,32,5)
        "b1":  jax.random.normal(k2, (C1,), jnp.float32) * 0.1,
        "w2":  jax.random.normal(k3, (C2, C1, K2, K2), jnp.float32) * 0.05,  # Conv2d(32,64,3)
        "b2":  jax.random.normal(k4, (C2,), jnp.float32) * 0.05,
        "wfc": jax.random.normal(k5, (N_OUT, C2 * H2 * W2), jnp.float32) * 0.05,  # Linear(384,7)
        "bfc": jax.random.normal(k6, (N_OUT,), jnp.float32) * 0.05,
    }


# ----------------------------------------------------------------------------
# Pure-numpy reference (direct convolutions, PyTorch semantics) for checking
# ----------------------------------------------------------------------------
def numpy_reference(state, params):
    x = np.asarray(state, np.float64)
    w1 = np.asarray(params["w1"], np.float64); b1 = np.asarray(params["b1"], np.float64)
    w2 = np.asarray(params["w2"], np.float64); b2 = np.asarray(params["b2"], np.float64)
    wfc = np.asarray(params["wfc"], np.float64); bfc = np.asarray(params["bfc"], np.float64)
    B = x.shape[0]
    xp = np.zeros((B, ROWS + 2 * P1, COLS + 2 * P1), np.float64)
    xp[:, P1:P1 + ROWS, P1:P1 + COLS] = x
    y1 = np.zeros((B, C1, H1, W1), np.float64)
    for oh in range(H1):
        for ow in range(W1):
            patch = xp[:, oh:oh + K1, ow:ow + K1].reshape(B, K1 * K1)
            y1[:, :, oh, ow] = patch @ w1.reshape(C1, -1).T + b1
    y1 = np.maximum(y1, 0.0)
    y2 = np.zeros((B, C2, H2, W2), np.float64)
    for oh in range(H2):
        for ow in range(W2):
            patch = y1[:, :, oh:oh + K2, ow:ow + K2].reshape(B, C1 * K2 * K2)
            y2[:, :, oh, ow] = patch @ w2.reshape(C2, -1).T + b2
    y2 = np.maximum(y2, 0.0)
    return y2.reshape(B, -1) @ wfc.T + bfc


if __name__ == "__main__":
    key = jax.random.PRNGKey(0)
    k_params, k_x1, k_x2 = jax.random.split(key, 3)
    params = init_params(k_params)
    prep = prepare_params(params)        # one-time weight lowering (outside jit)

    fwd = jax.jit(conv_model_forward, static_argnames=("batch_tile",))

    # Small-batch / latency path (B=2 -> single 16-row tile).
    x = jax.random.normal(k_x1, (2, ROWS, COLS), jnp.float32)
    out = jax.block_until_ready(fwd(x, prep))
    assert out.shape == (2, N_OUT), out.shape
    assert bool(jnp.all(jnp.isfinite(out)))
    ref = numpy_reference(np.asarray(x), params)
    # bf16 MXU path: loosened tolerance (f32 accumulation, bf16 operands/output).
    np.testing.assert_allclose(np.asarray(out), ref, rtol=5e-2, atol=5e-2)

    # Multi-tile path: exercises the batch grid, even tile count (v7x TC parity)
    # and balanced padding (B=37, batch_tile=16 -> 4 tiles of 16 rows).
    x2 = jax.random.normal(k_x2, (37, ROWS, COLS), jnp.float32)
    out2 = jax.block_until_ready(fwd(x2, prep, batch_tile=16))
    assert out2.shape == (37, N_OUT), out2.shape
    assert bool(jnp.all(jnp.isfinite(out2)))
    ref2 = numpy_reference(np.asarray(x2), params)
    np.testing.assert_allclose(np.asarray(out2), ref2, rtol=5e-2, atol=5e-2)

    print("KERNEL_OK")
</pallas_src>

<mosaic_0001>
module attributes {stable_mosaic.version = 11 : i64} {
  func.func @fused_forward_kernel(%arg0: i32, %arg1: memref<16x42xbf16, #tpu.memory_space<vmem>>, %arg2: memref<42x640xbf16, #tpu.memory_space<vmem>>, %arg3: memref<1x640xf32, #tpu.memory_space<vmem>>, %arg4: memref<640x384xbf16, #tpu.memory_space<vmem>>, %arg5: memref<1x384xf32, #tpu.memory_space<vmem>>, %arg6: memref<384x128xbf16, #tpu.memory_space<vmem>>, %arg7: memref<1x128xf32, #tpu.memory_space<vmem>>, %arg8: memref<16x128xbf16, #tpu.memory_space<vmem>>) attributes {dimension_semantics = [#tpu.dimension_semantics<parallel>], iteration_bounds = array<i64: 1>, scalar_prefetch = 0 : i64, scratch_operands = 0 : i64, tpu.core_type = #tpu.core_type<tc>, window_params = [{transform_indices = @transform_0, window_bounds = array<i64: 16, 42>}, {pipeline_mode = #tpu.pipeline_mode<synchronous>, transform_indices = @transform_1, window_bounds = array<i64: 42, 640>}, {pipeline_mode = #tpu.pipeline_mode<synchronous>, transform_indices = @transform_2, window_bounds = array<i64: 1, 640>}, {pipeline_mode = #tpu.pipeline_mode<synchronous>, transform_indices = @transform_3, window_bounds = array<i64: 640, 384>}, {pipeline_mode = #tpu.pipeline_mode<synchronous>, transform_indices = @transform_4, window_bounds = array<i64: 1, 384>}, {pipeline_mode = #tpu.pipeline_mode<synchronous>, transform_indices = @transform_5, window_bounds = array<i64: 384, 128>}, {pipeline_mode = #tpu.pipeline_mode<synchronous>, transform_indices = @transform_6, window_bounds = array<i64: 1, 128>}, {transform_indices = @transform_7, window_bounds = array<i64: 16, 128>}]} {
    %c0 = arith.constant 0 : index
    %c0_0 = arith.constant 0 : index
    %0 = vector.load %arg1[%c0, %c0_0] : memref<16x42xbf16, #tpu.memory_space<vmem>>, vector<16x42xbf16>
    %c0_1 = arith.constant 0 : index
    %c0_2 = arith.constant 0 : index
    %1 = vector.load %arg2[%c0_1, %c0_2] : memref<42x640xbf16, #tpu.memory_space<vmem>>, vector<42x640xbf16>
    %cst = arith.constant dense<0.000000e+00> : vector<16x640xf32>
    %2 = tpu.matmul %0, %1, %cst {dimension_numbers = #tpu.dot_dimension_numbers<[1], [0], [0], [1], [0, 0, 1, 1], [], []>} : vector<16x42xbf16>, vector<42x640xbf16>, vector<16x640xf32> -> vector<16x640xf32>
    %c0_3 = arith.constant 0 : index
    %c0_4 = arith.constant 0 : index
    %3 = vector.load %arg3[%c0_3, %c0_4] : memref<1x640xf32, #tpu.memory_space<vmem>>, vector<1x640xf32>
    %4 = vector.broadcast %3 : vector<1x640xf32> to vector<16x640xf32>
    %5 = arith.addf %2, %4 : vector<16x640xf32>
    %cst_5 = arith.constant 0.000000e+00 : f32
    %6 = vector.broadcast %cst_5 : f32 to vector<16x640xf32>
    %7 = arith.maximumf %5, %6 : vector<16x640xf32>
    %8 = arith.truncf %7 : vector<16x640xf32> to vector<16x640xbf16>
    %c0_6 = arith.constant 0 : index
    %c0_7 = arith.constant 0 : index
    %9 = vector.load %arg4[%c0_6, %c0_7] : memref<640x384xbf16, #tpu.memory_space<vmem>>, vector<640x384xbf16>
    %cst_8 = arith.constant dense<0.000000e+00> : vector<16x384xf32>
    %10 = tpu.matmul %8, %9, %cst_8 {dimension_numbers = #tpu.dot_dimension_numbers<[1], [0], [0], [1], [0, 0, 1, 1], [], []>} : vector<16x640xbf16>, vector<640x384xbf16>, vector<16x384xf32> -> vector<16x384xf32>
    %c0_9 = arith.constant 0 : index
    %c0_10 = arith.constant 0 : index
    %11 = vector.load %arg5[%c0_9, %c0_10] : memref<1x384xf32, #tpu.memory_space<vmem>>, vector<1x384xf32>
    %12 = vector.broadcast %11 : vector<1x384xf32> to vector<16x384xf32>
    %13 = arith.addf %10, %12 : vector<16x384xf32>
    %cst_11 = arith.constant 0.000000e+00 : f32
    %14 = vector.broadcast %cst_11 : f32 to vector<16x384xf32>
    %15 = arith.maximumf %13, %14 : vector<16x384xf32>
    %16 = arith.truncf %15 : vector<16x384xf32> to vector<16x384xbf16>
    %c0_12 = arith.constant 0 : index
    %c0_13 = arith.constant 0 : index
    %17 = vector.load %arg6[%c0_12, %c0_13] : memref<384x128xbf16, #tpu.memory_space<vmem>>, vector<384x128xbf16>
    %cst_14 = arith.constant dense<0.000000e+00> : vector<16x128xf32>
    %18 = tpu.matmul %16, %17, %cst_14 {dimension_numbers = #tpu.dot_dimension_numbers<[1], [0], [0], [1], [0, 0, 1, 1], [], []>} : vector<16x384xbf16>, vector<384x128xbf16>, vector<16x128xf32> -> vector<16x128xf32>
    %c0_15 = arith.constant 0 : index
    %c0_16 = arith.constant 0 : index
    %19 = vector.load %arg7[%c0_15, %c0_16] : memref<1x128xf32, #tpu.memory_space<vmem>>, vector<1x128xf32>
    %20 = vector.broadcast %19 : vector<1x128xf32> to vector<16x128xf32>
    %21 = arith.addf %18, %20 : vector<16x128xf32>
    %22 = arith.truncf %21 : vector<16x128xf32> to vector<16x128xbf16>
    %c0_17 = arith.constant 0 : index
    %c0_18 = arith.constant 0 : index
    %23 = vector.load %arg8[%c0_17, %c0_18] : memref<16x128xbf16, #tpu.memory_space<vmem>>, vector<16x128xbf16>
    tpu.vector_store %arg8[%c0_17, %c0_18], %22 {strides = array<i32>} : memref<16x128xbf16, #tpu.memory_space<vmem>>, vector<16x128xbf16>,
    return
  }
  func.func @transform_0(%arg0: i32) -> (i32, i32) {
    %c0_i32 = arith.constant 0 : i32
    %c0_i32_0 = arith.constant 0 : i32
    return %arg0, %c0_i32 : i32, i32
  }
  func.func @transform_1(%arg0: i32) -> (i32, i32) {
    %c0_i32 = arith.constant 0 : i32
    %c0_i32_0 = arith.constant 0 : i32
    %c0_i32_1 = arith.constant 0 : i32
    return %c0_i32, %c0_i32_0 : i32, i32
  }
  func.func @transform_2(%arg0: i32) -> (i32, i32) {
    %c0_i32 = arith.constant 0 : i32
    %c0_i32_0 = arith.constant 0 : i32
    %c0_i32_1 = arith.constant 0 : i32
    return %c0_i32, %c0_i32_0 : i32, i32
  }
  func.func @transform_3(%arg0: i32) -> (i32, i32) {
    %c0_i32 = arith.constant 0 : i32
    %c0_i32_0 = arith.constant 0 : i32
    %c0_i32_1 = arith.constant 0 : i32
    return %c0_i32, %c0_i32_0 : i32, i32
  }
  func.func @transform_4(%arg0: i32) -> (i32, i32) {
    %c0_i32 = arith.constant 0 : i32
    %c0_i32_0 = arith.constant 0 : i32
    %c0_i32_1 = arith.constant 0 : i32
    return %c0_i32, %c0_i32_0 : i32, i32
  }
  func.func @transform_5(%arg0: i32) -> (i32, i32) {
    %c0_i32 = arith.constant 0 : i32
    %c0_i32_0 = arith.constant 0 : i32
    %c0_i32_1 = arith.constant 0 : i32
    return %c0_i32, %c0_i32_0 : i32, i32
  }
  func.func @transform_6(%arg0: i32) -> (i32, i32) {
    %c0_i32 = arith.constant 0 : i32
    %c0_i32_0 = arith.constant 0 : i32
    %c0_i32_1 = arith.constant 0 : i32
    return %c0_i32, %c0_i32_0 : i32, i32
  }
  func.func @transform_7(%arg0: i32) -> (i32, i32) {
    %c0_i32 = arith.constant 0 : i32
    %c0_i32_0 = arith.constant 0 : i32
    return %arg0, %c0_i32 : i32, i32
  }
}

</mosaic_0001>

<bundles_post_ra>
// kernel: conv_model_forward.1
= control target key start
LH: loop header
LB: loop body
LE: loop exit
PB: predicated region body
PF: predicated region fallthrough
CT: control target
= control target key end

     0   :  { %12 = vsyncpa [#allocation3], 0  ;;  %s2475_s0 = inlined_call_operand.vmem [shape: bf16[16,42], index: 0, kind: input, shape index: {}]   ;;  %s2476_s1 = inlined_call_operand.hbm [shape: bf16[42,640], index: 1, kind: input, shape index: {}]   ;;  %s2477_s2 = inlined_call_operand.vmem [shape: f32[1,640], index: 2, kind: input, shape index: {}]   ;;  %s2478_s3 = inlined_call_operand.hbm [shape: bf16[640,384], index: 3, kind: input, shape index: {}]   ;;  %s2479_s4 = inlined_call_operand.vmem [shape: f32[1,384], index: 4, kind: input, shape index: {}]   ;;  %s2480_s5 = inlined_call_operand.hbm [shape: bf16[384,128], index: 5, kind: input, shape index: {}]   ;;  %s2481_s6 = inlined_call_operand.vmem [shape: f32[1,128], index: 6, kind: input, shape index: {}]   ;;  %s2482_s7 = inlined_call_operand.vmem [shape: bf16[16,128], index: 7, kind: output, shape index: {}]  }
   0x1   :  { %13 = vsyncpa [#allocation5], 0  ;;  %s2325_s24 = smov [#allocation4]  }
   0x2   :  { %s35_s25 = sshll.u32 %s2325_s24, 4  ;;  %s36_s25 = int_to_ptr.vmem [resolvable:$true] %s35_s25 }
   0x3   :  { %s2269_s26 = scalar_lea.vmem %s36_s25, 15360  ;;  %p2274_p1 = scmp.lt.s32.totalorder %s36_s25, %s36_s25 }
   0x4   :  { %p2270_p0 = scmp.ne.s32.totalorder %s36_s25, %s2269_s26  ;;  %p2275_p2 = scmp.lt.s32.totalorder %s2269_s26, %s2269_s26 }
   0x6   :  { %p2276_p3 = por %p2275_p2, %p2274_p1 }
   0x8   :  { %p2277_p4 = pnand %p2276_p3, %p2270_p0 }
   0xa   :  { %2280 = shalt.err (!%p2277_p4)
}
   0xb   :  { %s2326_s27 = smov 192   ;;  %s2327_s28 = smov 12  }
   0xc   :  { %41 = dma.hbm_to_vmem [thread:$0]  %s2478_s3, 15360, %s36_s25, [#allocation5], %s2326_s27, %s2326_s27, %s2327_s28  }
   0xd   :  { %s2328_s8 = smov [#allocation2]  }
   0xe   :  { %s21_s9 = sshll.u32 %s2328_s8, 4  ;;  %s22_s9 = int_to_ptr.vmem [resolvable:$true] %s21_s9 }
   0xf   :  { %s2289_s10 = scalar_lea.vmem %s22_s9, 1920  ;;  %p2294_p6 = scmp.lt.s32.totalorder %s22_s9, %s22_s9 }
  0x10   :  { %p2290_p5 = scmp.ne.s32.totalorder %s22_s9, %s2289_s10  ;;  %p2295_p7 = scmp.lt.s32.totalorder %s2289_s10, %s2289_s10 }
  0x12   :  { %p2296_p8 = por %p2295_p7, %p2294_p6 }
  0x14   :  { %p2297_p9 = pnand %p2296_p8, %p2290_p5 }
  0x16   :  { %2300 = shalt.err (!%p2297_p9)
}
  0x17   :  { %s2329_s11 = smov 320   ;;  %s2330_s12 = smov 20  }
  0x18   :  { %27 = dma.hbm_to_vmem [thread:$0]  %s2476_s1, 1920, %s22_s9, [#allocation3], %s2329_s11, %s2329_s11, %s2330_s12  }
  0x19   :  { %s2331_s15 = smov [#allocation6]  }
  0x1a   :  { %s49_s16 = sshll.u32 %s2331_s15, 4  ;;  %s50_s16 = int_to_ptr.vmem [resolvable:$true] %s49_s16 }
  0x1b   :  { %s2309_s3 = scalar_lea.vmem %s50_s16, 3072  ;;  %p2314_p11 = scmp.lt.s32.totalorder %s50_s16, %s50_s16 }
  0x1c   :  { %p2310_p10 = scmp.ne.s32.totalorder %s50_s16, %s2309_s3  ;;  %p2315_p12 = scmp.lt.s32.totalorder %s2309_s3, %s2309_s3 }
  0x1e   :  { %p2316_p13 = por %p2315_p12, %p2314_p11 }
  0x20   :  { %p2317_p0 = pnand %p2316_p13, %p2310_p10 }
  0x22   :  { %2320 = shalt.err (!%p2317_p0)
}
  0x23   :  { %s2332_s17 = smov 64   ;;  %s2333_s18 = smov 4  }
  0x24   :  { %55 = dma.hbm_to_vmem [thread:$0]  %s2480_s5, 3072, %s50_s16, [#allocation5], %s2332_s17, %s2332_s17, %s2333_s18  }
  0x25   :  { %2321 = dma.done.wait [#allocation3], 1920  }
  0x26   :  { %2322 = vsyncadd [#allocation3], 4294965376 }
  0x27   :  { %2323 = dma.done.wait [#allocation5], 18432  }
  0x28   :  { %2324 = vsyncadd [#allocation5], 4294948864  ;;  %v2334_v0 = vmov 0   ;;  %vm197_vm0 = vcmask 1044480   ;;  %v2061_v5 = vld [vmem:[#allocation2 + $0x2c] ss:$20 sps:$4 sm:$0xff]  }
  0x29   :  { %245 = vmatprep.mubr.bf16.mxu0 %v2334_v0  ;;  %288 = vmatprep.mubr.bf16.mxu1 %v2334_v0  ;;  %v2055_v1 = vld [vmem:[#allocation2 + $0x54] ss:$20 sps:$4 sm:$0x1f]   ;;  %v2057_v2 = vld [vmem:[#allocation2 + $0x5c] ss:$20 sps:$4 sm:$0x1f]  }
  0x2a   :  { %1746 = vmatprep.subr.msk.bf16.mxu0 %vm197_vm0, %v2055_v1  ;;  %v2059_v3 = vld [vmem:[#allocation2 + $0x50] ss:$20 sps:$4 sm:$0x1f]   ;;  %v2060_v4 = vld [vmem:[#allocation2 + $0x58] ss:$20 sps:$4 sm:$0x1f]   ;;  %1748 = vmatprep.subr.msk.bf16.mxu1 %vm197_vm0, %v2057_v2 }
  0x2b   :  { %v199_v6 = vsel %vm197_vm0, %v2059_v3, 0  ;;  %v205_v7 = vsel %vm197_vm0, %v2060_v4, 0  ;;  %v2063_v8 = vld [vmem:[#allocation2 + $0x34] ss:$20 sps:$4 sm:$0xff]   ;;  %v2066_v10 = vld [vmem:[#allocation2 + $0x30] ss:$20 sps:$4 sm:$0xff]  }
  0x2c   :  { %224 = vmatpush1.bf16.msra.mxu0 %v199_v6  ;;  %267 = vmatpush1.bf16.msra.mxu1 %v205_v7  ;;  %v2065_v9 = vld [vmem:[#allocation2 + $0x28] ss:$20 sps:$4 sm:$0xff]   ;;  %v2067_v11 = vld [vmem:[#allocation2 + $0x4] ss:$20 sps:$4 sm:$0xff]   ;;  %v2069_v12 = vld [vmem:[#allocation2 + $0xc] ss:$20 sps:$4 sm:$0xff]  }
  0x2d   :  { %225 = vmatprep.subr.bf16.mxu0 %v2061_v5  ;;  %268 = vmatprep.subr.bf16.mxu1 %v2063_v8  ;;  %v2071_v13 = vld [vmem:[#allocation2] ss:$20 sps:$4 sm:$0xff]   ;;  %v2072_v14 = vld [vmem:[#allocation2 + $0x8] ss:$20 sps:$4 sm:$0xff]   ;;  %vm193_vm1 = vcmask 343040   ;;  %v2335_v18 = vmov 0.0  }
  0x2e   :  { %v2074_v15 = vld [vmem:[#allocation2 + $0x60] ss:$20 sps:$4 sm:$0x1f]   ;;  %v2079_v17 = vld [vmem:[#allocation4 + $0xac] ss:$12 sps:$4 sm:$0xff]   ;;  %vm2336_vm2 = vmmov 0  }
  0x2f   :  { %v2073_v16 = vld [vmem:[%s2475_s0] sm:$0xff]   ;;  %v211_v19 = vsel %vm197_vm0, %v2074_v15, 0  ;;  %v2085_v21 = vld [vmem:[#allocation4 + $0x94] ss:$12 sps:$4 sm:$0xff]   ;;  %v2083_v23 = vld [vmem:[#allocation4 + $0x90] ss:$12 sps:$4 sm:$0xff]  }
  0x30   :  { %226 = vmatpush1.bf16.msra.mxu0 %v2065_v9  ;;  %269 = vmatpush1.bf16.msra.mxu1 %v2066_v10  ;;  %v2077_v20 = vld [vmem:[#allocation4 + $0xa8] ss:$12 sps:$4 sm:$0xff]   ;;  %v2076_v25 = vld [vmem:[#allocation2 + $0x10] ss:$20 sps:$4 sm:$0xff]   ;;  %v2097_v28 = vld [vmem:[#allocation4 + $0x64] ss:$12 sps:$4 sm:$0xff]  }
  0x31   :  { %227 = vmatprep.subr.bf16.mxu0 %v2067_v11  ;;  %270 = vmatprep.subr.bf16.mxu1 %v2069_v12  ;;  %v2075_v22 = vld [vmem:[#allocation2 + $0x38] ss:$20 sps:$4 sm:$0xff]   ;;  %v2091_v24 = vld [vmem:[#allocation4 + $0x7c] ss:$12 sps:$4 sm:$0xff]   ;;  %v2082_v26 = vld [vmem:[#allocation4 + $0x22c] ss:$12 sps:$4 sm:$0xff]  }
  0x32   :  { %v2089_v27 = vld [vmem:[#allocation4 + $0x78] ss:$12 sps:$4 sm:$0xff]   ;;  %v2080_v29 = vld [vmem:[#allocation4 + $0x228] ss:$12 sps:$4 sm:$0xff]   ;;  %v2095_v31 = vld [vmem:[#allocation4 + $0x60] ss:$12 sps:$4 sm:$0xff]  }
  0x33   :  { %v2088_v30 = vld [vmem:[#allocation4 + $0x214] ss:$12 sps:$4 sm:$0xff]   ;;  %v2103_v32 = vld [vmem:[#allocation4 + $0x4c] ss:$12 sps:$4 sm:$0xff]   ;;  %v2086_v33 = vld [vmem:[#allocation4 + $0x210] ss:$12 sps:$4 sm:$0xff]  }
  0x34   :  { %228 = vmatpush1.bf16.msra.mxu0 %v2071_v13  ;;  %271 = vmatpush1.bf16.msra.mxu1 %v2072_v14  ;;  %v2094_v34 = vld [vmem:[#allocation4 + $0x1fc] ss:$12 sps:$4 sm:$0xff]   ;;  %v2109_v36 = vld [vmem:[#allocation4 + $0x34] ss:$12 sps:$4 sm:$0xff]   ;;  %v2092_v37 = vld [vmem:[#allocation4 + $0x1f8] ss:$12 sps:$4 sm:$0xff]  }
  0x35   :  { %1993 = vmatprep.subr.bf16.mxu0 %v2335_v18  ;;  %1172 = vmatprep.subr.bf16.mxu1 %v2079_v17  ;;  %v2101_v35 = vld [vmem:[#allocation4 + $0x48] ss:$12 sps:$4 sm:$0xff]   ;;  %v2100_v38 = vld [vmem:[#allocation4 + $0x1e4] ss:$12 sps:$4 sm:$0xff]   ;;  %v2098_v41 = vld [vmem:[#allocation4 + $0x1e0] ss:$12 sps:$4 sm:$0xff]  }
  0x36   :  { %v2107_v39 = vld [vmem:[#allocation4 + $0x30] ss:$12 sps:$4 sm:$0xff]   ;;  %v2106_v42 = vld [vmem:[#allocation4 + $0x1cc] ss:$12 sps:$4 sm:$0xff]   ;;  %v2104_v45 = vld [vmem:[#allocation4 + $0x1c8] ss:$12 sps:$4 sm:$0xff]  }
  0x37   :  { %1747 = vmatmul.mubr.msk.bf16.vlgmr.msra.gmra.mxu0 %vm193_vm1, %v2073_v16  ;;  %1749 = vmatmul.mubr.msk.bf16.vlgmr.msra.gmra.mxu1 %vm193_vm1, %v2073_v16  ;;  %v2115_v40 = vld [vmem:[#allocation4 + $0x1c] ss:$12 sps:$4 sm:$0xff]   ;;  %v2113_v43 = vld [vmem:[#allocation4 + $0x18] ss:$12 sps:$4 sm:$0xff]   ;;  %v2112_v46 = vld [vmem:[#allocation4 + $0x1b4] ss:$12 sps:$4 sm:$0xff]  }
  0x38   :  { %1994 = vmatpush3.bf16.msra.mxu0 %v211_v19  ;;  %1999 = vmatprep.mubr.msk.bf16.mxu0 %vm2336_vm2, %v2335_v18  ;;  %v2121_v44 = vld [vmem:[#allocation4 + $0x4] ss:$12 sps:$4 sm:$0xff]   ;;  %v2119_v47 = vld [vmem:[#allocation4] ss:$12 sps:$4 sm:$0xff]   ;;  %v2118_v50 = vld [vmem:[#allocation4 + $0x19c] ss:$12 sps:$4 sm:$0xff]  }
  0x39   :  { %1995 = vmatprep.subr.bf16.mxu0 %v2335_v18  ;;  %1173 = vmatpush1.bf16.msra.mxu1 %v2077_v20  ;;  %v2127_v48 = vld [vmem:[#allocation4 + $0x16c] ss:$12 sps:$4 sm:$0xff]   ;;  %v2110_v49 = vld [vmem:[#allocation4 + $0x1b0] ss:$12 sps:$4 sm:$0xff]   ;;  %v2125_v51 = vld [vmem:[#allocation4 + $0x168] ss:$12 sps:$4 sm:$0xff]  }
  0x3a   :  { %1174 = vmatprep.subr.bf16.mxu1 %v2085_v21  ;;  %v2116_v52 = vld [vmem:[#allocation4 + $0x198] ss:$12 sps:$4 sm:$0xff]   ;;  %v2133_v53 = vld [vmem:[#allocation4 + $0x154] ss:$12 sps:$4 sm:$0xff]   ;;  %v2131_v55 = vld [vmem:[#allocation4 + $0x150] ss:$12 sps:$4 sm:$0xff]  }
  0x3b   :  { %v2124_v54 = vld [vmem:[#allocation4 + $0x184] ss:$12 sps:$4 sm:$0xff]   ;;  %v2139_v56 = vld [vmem:[#allocation4 + $0x13c] ss:$12 sps:$4 sm:$0xff]   ;;  %v2122_v57 = vld [vmem:[#allocation4 + $0x180] ss:$12 sps:$4 sm:$0xff]  }
  0x3c   :  { %1996 = vmatpush3.bf16.msra.mxu0 %v2075_v22  ;;  %v2130_v58 = vld [vmem:[#allocation4 + $0x2ec] ss:$12 sps:$4 sm:$0xff]   ;;  %v2145_v60 = vld [vmem:[#allocation4 + $0x124] ss:$12 sps:$4 sm:$0xff]   ;;  %v2128_v61 = vld [vmem:[#allocation4 + $0x2e8] ss:$12 sps:$4 sm:$0xff]  }
  0x3d   :  { %1997 = vmatprep.subr.bf16.mxu0 %v2335_v18  ;;  %1175 = vmatpush1.bf16.msra.mxu1 %v2083_v23  ;;  %v2137_v59 = vld [vmem:[#allocation4 + $0x138] ss:$12 sps:$4 sm:$0xff]   ;;  %v2136_v62 = vld [vmem:[#allocation4 + $0x2d4] ss:$12 sps:$4 sm:$0xff]   ;;  %v2134_v2 = vld [vmem:[#allocation4 + $0x2d0] ss:$12 sps:$4 sm:$0xff]  }
  0x3e   :  { %1176 = vmatprep.subr.bf16.mxu1 %v2091_v24  ;;  %v2143_v63 = vld [vmem:[#allocation4 + $0x120] ss:$12 sps:$4 sm:$0xff]   ;;  %v2142_v3 = vld [vmem:[#allocation4 + $0x2bc] ss:$12 sps:$4 sm:$0xff]   ;;  %v2140_v5 = vld [vmem:[#allocation4 + $0x2b8] ss:$12 sps:$4 sm:$0xff]  }
  0x3f   :  { %v2151_v1 = vld [vmem:[#allocation4 + $0x10c] ss:$12 sps:$4 sm:$0xff]   ;;  %v2149_v4 = vld [vmem:[#allocation4 + $0x108] ss:$12 sps:$4 sm:$0xff]   ;;  %v2148_v6 = vld [vmem:[#allocation4 + $0x2a4] ss:$12 sps:$4 sm:$0xff]  }
  0x40   :  { %1998 = vmatpush3.bf16.msra.mxu0 %v2076_v25  ;;  %v2146_v7 = vld [vmem:[#allocation4 + $0x2a0] ss:$12 sps:$4 sm:$0xff]   ;;  %v2152_v9 = vld [vmem:[#allocation4 + $0x288] ss:$12 sps:$4 sm:$0xff]   ;;  %v2155_v12 = vld [vmem:[#allocation4 + $0xf0] ss:$12 sps:$4 sm:$0xff]   ;;  %v90_v25 = vlaneseq }
  0x41   :  { %1215 = vmatprep.subr.bf16.mxu0 %v2082_v26  ;;  %1177 = vmatpush1.bf16.msra.mxu1 %v2089_v27  ;;  %v2154_v8 = vld [vmem:[#allocation4 + $0x28c] ss:$12 sps:$4 sm:$0xff]   ;;  %v2157_v10 = vld [vmem:[#allocation4 + $0xf4] ss:$12 sps:$4 sm:$0xff]   ;;  %v2158_v13 = vld [vmem:[#allocation4 + $0x270] ss:$12 sps:$4 sm:$0xff]  }
  0x42   :  { %1178 = vmatprep.subr.bf16.mxu1 %v2097_v28  ;;  %v2160_v11 = vld [vmem:[#allocation4 + $0x274] ss:$12 sps:$4 sm:$0xff]   ;;  %v2163_v14 = vld [vmem:[#allocation4 + $0xdc] ss:$12 sps:$4 sm:$0xff]   ;;  %v2164_v17 = vld [vmem:[#allocation4 + $0x258] ss:$12 sps:$4 sm:$0xff]  }
  0x43   :  { %2000 = vmatmul.mubr.msk.bf16.vlgmr.msra.gmra.mxu0 %vm193_vm1, %v2073_v16  ;;  %v2166_v15 = vld [vmem:[#allocation4 + $0x25c] ss:$12 sps:$4 sm:$0xff]   ;;  %v2161_v16 = vld [vmem:[#allocation4 + $0xd8] ss:$12 sps:$4 sm:$0xff]   ;;  %v2167_v21 = vld [vmem:[#allocation4 + $0xc0] ss:$12 sps:$4 sm:$0xff]  }
  0x44   :  { %1216 = vmatpush1.bf16.msra.mxu0 %v2080_v29  ;;  %v2169_v19 = vld [vmem:[#allocation4 + $0xc4] ss:$12 sps:$4 sm:$0xff]   ;;  %v2170_v22 = vld [vmem:[#allocation4 + $0x240] ss:$12 sps:$4 sm:$0xff]   ;;  %v2404_v26 = vshrl.u32 %v90_v25, 7 }
  0x45   :  { %1217 = vmatprep.subr.bf16.mxu0 %v2088_v30  ;;  %1179 = vmatpush1.bf16.msra.mxu1 %v2095_v31  ;;  %v2172_v20 = vld [vmem:[#allocation4 + $0x244] ss:$12 sps:$4 sm:$0xff]   ;;  %v2175_v23 = vld [vmem:[#allocation4 + $0x3ac] ss:$12 sps:$4 sm:$0xff]  }
  0x46   :  { %1180 = vmatprep.subr.bf16.mxu1 %v2103_v32  ;;  %v2176_v24 = vld [vmem:[#allocation4 + $0x170] ss:$12 sps:$4 sm:$0xff]   ;;  %v100_v27 = vsub.s32 2, %v2404_v26  ;;  %v104_v28 = vsub.s32 3, %v2404_v26  ;;  %v2411_v29 = vld [vmem:[%s2477_s2] sm:$0x1f] }
  0x47   :  { %v96_v30 = vsub.s32 1, %v2404_v26  ;;  %v92_v31 = vsub.s32 0, %v2404_v26  ;;  %v2201_v25 = vld [vmem:[#allocation4 + $0xf8] ss:$12 sps:$4 sm:$0xff]  }
  0x48   :  { %1218 = vmatpush1.bf16.msra.mxu0 %v2086_v33  ;;  %v101_v32 = vrot.slane %v2411_v29, %v100_v27  ;;  %v105_v33 = vrot.slane %v2411_v29, %v104_v28  ;;  %v2198_v28 = vld [vmem:[#allocation4 + $0x330] ss:$12 sps:$4 sm:$0xff]  }
  0x49   :  { %1219 = vmatprep.subr.bf16.mxu0 %v2094_v34  ;;  %1181 = vmatpush1.bf16.msra.mxu1 %v2101_v35 }
  0x4a   :  { %1182 = vmatprep.subr.bf16.mxu1 %v2109_v36  ;;  %v97_v36 = vrot.slane %v2411_v29, %v96_v30 }
  0x4c   :  { %1220 = vmatpush1.bf16.msra.mxu0 %v2092_v37  ;;  %v93_v37 = vrot.slane %v2411_v29, %v92_v31 }
  0x4d   :  { %1221 = vmatprep.subr.bf16.mxu0 %v2100_v38  ;;  %1183 = vmatpush1.bf16.msra.mxu1 %v2107_v39 }
  0x4e   :  { %1184 = vmatprep.subr.bf16.mxu1 %v2115_v40 }
  0x50   :  { %1222 = vmatpush1.bf16.msra.mxu0 %v2098_v41 }
  0x51   :  { %1223 = vmatprep.subr.bf16.mxu0 %v2106_v42  ;;  %1185 = vmatpush1.bf16.msra.mxu1 %v2113_v43 }
  0x52   :  { %1186 = vmatprep.subr.bf16.mxu1 %v2121_v44 }
  0x54   :  { %1224 = vmatpush1.bf16.msra.mxu0 %v2104_v45 }
  0x55   :  { %1225 = vmatprep.subr.bf16.mxu0 %v2112_v46  ;;  %1187 = vmatpush1.bf16.msra.mxu1 %v2119_v47 }
  0x56   :  { %1188 = vmatprep.subr.bf16.mxu1 %v2127_v48 }
  0x58   :  { %1226 = vmatpush1.bf16.msra.mxu0 %v2110_v49 }
  0x59   :  { %1227 = vmatprep.subr.bf16.mxu0 %v2118_v50  ;;  %1189 = vmatpush2.bf16.msra.mxu1 %v2125_v51 }
  0x5a   :  { %1190 = vmatprep.subr.bf16.mxu1 %v2133_v53 }
  0x5c   :  { %1228 = vmatpush1.bf16.msra.mxu0 %v2116_v52 }
  0x5d   :  { %1229 = vmatprep.subr.bf16.mxu0 %v2124_v54  ;;  %1191 = vmatpush2.bf16.msra.mxu1 %v2131_v55 }
  0x5e   :  { %1192 = vmatprep.subr.bf16.mxu1 %v2139_v56 }
  0x60   :  { %1230 = vmatpush1.bf16.msra.mxu0 %v2122_v57 }
  0x61   :  { %1231 = vmatprep.subr.bf16.mxu0 %v2130_v58  ;;  %1193 = vmatpush2.bf16.msra.mxu1 %v2137_v59 }
  0x62   :  { %1194 = vmatprep.subr.bf16.mxu1 %v2145_v60 }
  0x64   :  { %1232 = vmatpush2.bf16.msra.mxu0 %v2128_v61 }
  0x65   :  { %1233 = vmatprep.subr.bf16.mxu0 %v2136_v62  ;;  %1195 = vmatpush2.bf16.msra.mxu1 %v2143_v63  ;;  %v2173_v63 = vld [vmem:[#allocation4 + $0x3a8] ss:$12 sps:$4 sm:$0xff]  }
  0x66   :  { %1196 = vmatprep.subr.bf16.mxu1 %v2151_v1  ;;  %v2177_v1 = vld [vmem:[#allocation4 + $0xb0] ss:$12 sps:$4 sm:$0xff]  }
  0x68   :  { %1234 = vmatpush2.bf16.msra.mxu0 %v2134_v2 }
  0x69   :  { %1235 = vmatprep.subr.bf16.mxu0 %v2142_v3  ;;  %1197 = vmatpush2.bf16.msra.mxu1 %v2149_v4  ;;  %v2180_v3 = vld [vmem:[#allocation4 + $0x394] ss:$12 sps:$4 sm:$0xff]  }
  0x6a   :  { %1198 = vmatprep.subr.bf16.mxu1 %v2157_v10  ;;  %v2186_v10 = vld [vmem:[#allocation4 + $0x140] ss:$12 sps:$4 sm:$0xff]  }
  0x6c   :  { %1236 = vmatpush2.bf16.msra.mxu0 %v2140_v5  ;;  %v2181_v5 = vld [vmem:[#allocation4 + $0x158] ss:$12 sps:$4 sm:$0xff]  }
  0x6d   :  { %1237 = vmatprep.subr.bf16.mxu0 %v2148_v6  ;;  %1199 = vmatpush2.bf16.msra.mxu1 %v2155_v12 }
  0x6e   :  { %1200 = vmatprep.subr.bf16.mxu1 %v2163_v14  ;;  %v2187_v14 = vld [vmem:[#allocation4 + $0x80] ss:$12 sps:$4 sm:$0xff]  }
  0x70   :  { %1238 = vmatpush2.bf16.msra.mxu0 %v2146_v7  ;;  %v2178_v7 = vld [vmem:[#allocation4 + $0x390] ss:$12 sps:$4 sm:$0xff]  }
  0x71   :  { %1239 = vmatprep.subr.bf16.mxu0 %v2154_v8  ;;  %1201 = vmatpush2.bf16.msra.mxu1 %v2161_v16  ;;  %v2182_v8 = vld [vmem:[#allocation4 + $0x98] ss:$12 sps:$4 sm:$0xff]   ;;  %v2191_v16 = vld [vmem:[#allocation4 + $0x128] ss:$12 sps:$4 sm:$0xff]  }
  0x72   :  { %1202 = vmatprep.subr.bf16.mxu1 %v2169_v19  ;;  %v2192_v19 = vld [vmem:[#allocation4 + $0x68] ss:$12 sps:$4 sm:$0xff]  }
  0x74   :  { %1240 = vmatpush2.bf16.msra.mxu0 %v2152_v9  ;;  %v2185_v9 = vld [vmem:[#allocation4 + $0x37c] ss:$12 sps:$4 sm:$0xff]  }
  0x75   :  { %1241 = vmatprep.subr.bf16.mxu0 %v2160_v11  ;;  %1203 = vmatpush2.bf16.msra.mxu1 %v2167_v21  ;;  %v2196_v21 = vld [vmem:[#allocation4 + $0x110] ss:$12 sps:$4 sm:$0xff]  }
  0x76   :  { %1258 = vmatprep.subr.bf16.mxu1 %v2175_v23  ;;  %v108_v23 = vsub.s32 4, %v2404_v26 }
  0x78   :  { %1242 = vmatpush2.bf16.msra.mxu0 %v2158_v13  ;;  %v2183_v13 = vld [vmem:[#allocation4 + $0x378] ss:$12 sps:$4 sm:$0xff]  }
  0x79   :  { %1243 = vmatprep.subr.bf16.mxu0 %v2166_v15  ;;  %v2190_v15 = vld [vmem:[#allocation4 + $0x364] ss:$12 sps:$4 sm:$0xff]  }
  0x7c   :  { %1244 = vmatpush2.bf16.msra.mxu0 %v2164_v17  ;;  %v2188_v17 = vld [vmem:[#allocation4 + $0x360] ss:$12 sps:$4 sm:$0xff]  }
  0x7d   :  { %1245 = vmatprep.subr.bf16.mxu0 %v2172_v20  ;;  %v2195_v20 = vld [vmem:[#allocation4 + $0x34c] ss:$12 sps:$4 sm:$0xff]  }
  0x80   :  { %1246 = vmatpush2.bf16.msra.mxu0 %v2170_v22  ;;  %v2197_v22 = vld [vmem:[#allocation4 + $0x50] ss:$12 sps:$4 sm:$0xff]  }
  0x81   :  { %1909 = vmatprep.subr.bf16.mxu0 %v2176_v24  ;;  %v2200_v24 = vld [vmem:[#allocation4 + $0x334] ss:$12 sps:$4 sm:$0xff]  }
  0xf7   :  { %v247_v34 = vpop.f32.mrf.mxu0  ;;  %v290_v35 = vpop.f32.mrf.mxu1 }
  0xf8   :  { %v291_v38 = vadd.f32 %v290_v35, %v101_v32  ;;  %v248_v47 = vadd.f32 %v247_v34, %v93_v37  ;;  %v2205_v34 = vld [vmem:[#allocation4 + $0x31c] ss:$12 sps:$4 sm:$0xff]   ;;  %v2206_v35 = vld [vmem:[#allocation4 + $0xe0] ss:$12 sps:$4 sm:$0xff]  }
  0xf9   :  { %v249_v39 = vpop.f32.mrf.mxu0  ;;  %v292_v40 = vpop.f32.mrf.mxu1 }
  0xfa   :  { %v293_v41 = vadd.f32 %v292_v40, %v105_v33  ;;  %v250_v44 = vadd.f32 %v249_v39, %v97_v36  ;;  %v342_v48 = vmax.f32 %v291_v38, 0.0  ;;  %v340_v59 = vmax.f32 %v248_v47, 0.0  ;;  %v2210_v40 = vld [vmem:[#allocation4 + $0x304] ss:$12 sps:$4 sm:$0xff]  }
  0xfb   :  { %v251_v42 = vpop.f32.mrf.mxu0  ;;  %v294_v43 = vpop.f32.mrf.mxu1 }
  0xfc   :  { %v252_v45 = vadd.f32 %v251_v42, %v93_v37  ;;  %v295_v46 = vadd.f32 %v294_v43, %v101_v32  ;;  %v343_v51 = vmax.f32 %v293_v41, 0.0  ;;  %v341_v56 = vmax.f32 %v250_v44, 0.0  ;;  %v2202_v32 = vld [vmem:[#allocation4 + $0x38] ss:$12 sps:$4 sm:$0xff]   ;;  %v2207_v37 = vld [vmem:[#allocation4 + $0x20] ss:$12 sps:$4 sm:$0xff]  }
  0xfd   :  { %v253_v49 = vpop.f32.mrf.mxu0  ;;  %v296_v50 = vpop.f32.mrf.mxu1  ;;  %v2211_v41 = vld [vmem:[#allocation4 + $0xc8] ss:$12 sps:$4 sm:$0xff]   ;;  %v2208_v42 = vld [vmem:[#allocation4 + $0x300] ss:$12 sps:$4 sm:$0xff]  }
  0xfe   :  { %v347_v52 = vmax.f32 %v295_v46, 0.0  ;;  %v254_v53 = vadd.f32 %v253_v49, %v97_v36  ;;  %v297_v54 = vadd.f32 %v296_v50, %v105_v33  ;;  %v345_v55 = vmax.f32 %v252_v45, 0.0  ;;  %v2203_v36 = vld [vmem:[#allocation4 + $0x318] ss:$12 sps:$4 sm:$0xff]   ;;  %v2212_v43 = vld [vmem:[#allocation4 + $0x8] ss:$12 sps:$4 sm:$0xff]  }
  0xff   :  { %v109_v33 = vrot.slane %v2411_v29, %v108_v23  ;;  %v2213_v45 = vld [vmem:[#allocation4 + $0x2f0] ss:$12 sps:$4 sm:$0xff]   ;;  %v2216_v49 = vld [vmem:[#allocation4 + $0x2d8] ss:$12 sps:$4 sm:$0xff]  }
 0x100   :  { %v346_v57 = vmax.f32 %v254_v53, 0.0  ;;  %v348_v58 = vmax.f32 %v297_v54, 0.0  ;;  %v2425_v60 = vpack.c.bf16 %v347_v52, %v342_v48  ;;  %v2429_v2 = vpack.c.bf16 %v345_v55, %v340_v59  ;;  %v2214_v46 = vld [vmem:[#allocation4 + $0x230] ss:$12 sps:$4 sm:$0xff]   ;;  %v2217_v50 = vld [vmem:[#allocation4 + $0x218] ss:$12 sps:$4 sm:$0xff]  }
 0x101   :  { %v2215_v48 = vld [vmem:[#allocation4 + $0x3b0] ss:$12 sps:$4 sm:$0xff]   ;;  %v2219_v52 = vld [vmem:[#allocation4 + $0x2c0] ss:$12 sps:$4 sm:$0xff]   ;;  %v2222_v55 = vld [vmem:[#allocation4 + $0x2a8] ss:$12 sps:$4 sm:$0xff]  }
 0x102   :  { %v351_v61 = vpack.c.bf16 %v346_v57, %v341_v56  ;;  %v2427_v62 = vpack.c.bf16 %v348_v58, %v343_v51  ;;  %v2218_v51 = vld [vmem:[#allocation4 + $0x398] ss:$12 sps:$4 sm:$0xff]   ;;  %v2220_v53 = vld [vmem:[#allocation4 + $0x200] ss:$12 sps:$4 sm:$0xff]   ;;  %v2223_v56 = vld [vmem:[#allocation4 + $0x1e8] ss:$12 sps:$4 sm:$0xff]  }
 0x103   :  { %v333_v4 = vpop.f32.mrf.mxu0  ;;  %v2221_v54 = vld [vmem:[#allocation4 + $0x380] ss:$12 sps:$4 sm:$0xff]   ;;  %v2224_v57 = vld [vmem:[#allocation4 + $0x368] ss:$12 sps:$4 sm:$0xff]   ;;  %v2225_v58 = vld [vmem:[#allocation4 + $0x290] ss:$12 sps:$4 sm:$0xff]  }
 0x104   :  { %1204 = vmatprep.mubr.bf16.mxu1 %v351_v61  ;;  %1247 = vmatprep.mubr.bf16.mxu0 %v2427_v62  ;;  %v334_v38 = vadd.f32 %v333_v4, %v109_v33  ;;  %v2226_v59 = vld [vmem:[#allocation4 + $0x1d0] ss:$12 sps:$4 sm:$0xff]   ;;  %v2233_v4 = vld [vmem:[#allocation4 + $0x320] ss:$12 sps:$4 sm:$0xff]  }
 0x105   :  { %1205 = vmatmul.mubr.bf16.vlgmr.msra.gmra.mxu1 %v2429_v2  ;;  %1248 = vmatmul.mubr.bf16.vlgmr.msra.gmra.mxu0 %v2425_v60  ;;  %v2001_v6 = vpop.f32.mrf.mxu0  ;;  %v2253_v23 = vld [vmem:[#allocation6 + $0xb8] sm:$0xff]  }
 0x106   :  { %1259 = vmatpush1.bf16.msra.mxu1 %v2173_v63  ;;  %1910 = vmatpush3.bf16.msra.mxu0 %v2177_v1  ;;  %v344_v44 = vmax.f32 %v334_v38, 0.0  ;;  %v2229_v63 = vld [vmem:[#allocation4 + $0x1b8] ss:$12 sps:$4 sm:$0xff]   ;;  %v2235_v6 = vld [vmem:[#allocation4 + $0x188] ss:$12 sps:$4 sm:$0xff]  }
 0x107   :  { %1333 = vmatprep.mubr.bf16.mxu0 %v351_v61  ;;  %1260 = vmatprep.subr.bf16.mxu1 %v2180_v3  ;;  %v336_v11 = vpop.f32.mrf.mxu0  ;;  %v2227_v61 = vld [vmem:[#allocation4 + $0x350] ss:$12 sps:$4 sm:$0xff]   ;;  %v2230_v1 = vld [vmem:[#allocation4 + $0x338] ss:$12 sps:$4 sm:$0xff]   ;;  %v2232_v3 = vld [vmem:[#allocation4 + $0x1a0] ss:$12 sps:$4 sm:$0xff]  }
 0x108   :  { %1911 = vmatprep.subr.bf16.mxu0 %v2181_v5  ;;  %1290 = vmatprep.mubr.bf16.mxu1 %v2334_v0  ;;  %v2193_v0 = vld [vmem:[#allocation4 + $0x348] ss:$12 sps:$4 sm:$0xff]   ;;  %v337_v39 = vadd.f32 %v336_v11, %v109_v33 }
 0x109   :  { %v2002_v12 = vpop.f32.mrf.mxu0  ;;  %v2234_v5 = vld [vmem:[#allocation4 + $0x248] ss:$12 sps:$4 sm:$0xff]  }
 0x10a   :  { %1261 = vmatpush1.bf16.msra.mxu1 %v2178_v7  ;;  %1912 = vmatpush3.bf16.msra.mxu0 %v2182_v8  ;;  %v349_v29 = vmax.f32 %v337_v39, 0.0  ;;  %v2236_v7 = vld [vmem:[#allocation4 + $0x308] ss:$12 sps:$4 sm:$0xff]   ;;  %v2237_v8 = vld [vmem:[#allocation6 + $0x78] sm:$0xff]  }
 0x10b   :  { %1262 = vmatprep.subr.bf16.mxu1 %v2185_v9  ;;  %1913 = vmatprep.subr.bf16.mxu0 %v2186_v10  ;;  %v2238_v9 = vld [vmem:[#allocation6 + $0x38] sm:$0xff]   ;;  %v2239_v10 = vld [vmem:[#allocation6 + $0x70] sm:$0xff]   ;;  %v2241_v12 = vld [vmem:[#allocation6 + $0x68] sm:$0xff]  }
 0x10c   :  { %v354_v47 = vpack.c.bf16 %v349_v29, %v344_v44  ;;  %v2240_v11 = vld [vmem:[#allocation6 + $0x30] sm:$0xff]   ;;  %v515_v39 = vld [vmem:[%s2479_s4] sm:$0x7] }
 0x10d   :  { %v2258_v33 = vld [vmem:[#allocation6 + $0x90] sm:$0xff]  }
 0x10e   :  { %1263 = vmatpush1.bf16.msra.mxu1 %v2183_v13  ;;  %1914 = vmatpush3.bf16.msra.mxu0 %v2187_v14  ;;  %v2242_v13 = vld [vmem:[#allocation6 + $0x28] sm:$0xff]   ;;  %v2243_v14 = vld [vmem:[#allocation6 + $0x60] sm:$0xff]  }
 0x10f   :  { %1264 = vmatprep.subr.bf16.mxu1 %v2190_v15  ;;  %1915 = vmatprep.subr.bf16.mxu0 %v2191_v16  ;;  %v2244_v15 = vld [vmem:[#allocation6 + $0x20] sm:$0xff]   ;;  %v2246_v16 = vld [vmem:[#allocation6 + $0x18] sm:$0xff]  }
 0x112   :  { %1265 = vmatpush1.bf16.msra.mxu1 %v2188_v17  ;;  %1916 = vmatpush3.bf16.msra.mxu0 %v2192_v19  ;;  %v2247_v17 = vld [vmem:[#allocation6 + $0x50] sm:$0xff]  }
 0x113   :  { %1266 = vmatprep.subr.bf16.mxu1 %v2195_v20  ;;  %1917 = vmatprep.subr.bf16.mxu0 %v2196_v21  ;;  %v2248_v19 = vld [vmem:[#allocation6 + $0x10] sm:$0xff]   ;;  %v2249_v20 = vld [vmem:[#allocation6 + $0x48] sm:$0xff]  }
 0x114   :  { %v2250_v21 = vld [vmem:[#allocation6 + $0x8] sm:$0xff]  }
 0x116   :  { %1267 = vmatpush1.bf16.msra.mxu1 %v2193_v0  ;;  %1918 = vmatpush3.bf16.msra.mxu0 %v2197_v22  ;;  %v2251_v0 = vld [vmem:[#allocation6 + $0x40] sm:$0xff]  }
 0x117   :  { %1268 = vmatprep.subr.bf16.mxu1 %v2200_v24  ;;  %1919 = vmatprep.subr.bf16.mxu0 %v2201_v25  ;;  %v2252_v22 = vld [vmem:[#allocation6] sm:$0xff]   ;;  %v2254_v24 = vld [vmem:[#allocation6 + $0xb0] sm:$0xff]   ;;  %v2255_v25 = vld [vmem:[#allocation6 + $0xa8] sm:$0xff]  }
 0x11a   :  { %1269 = vmatpush1.bf16.msra.mxu1 %v2198_v28  ;;  %1920 = vmatpush3.bf16.msra.mxu0 %v2202_v32  ;;  %v2256_v28 = vld [vmem:[#allocation6 + $0xa0] sm:$0xff]   ;;  %v2257_v32 = vld [vmem:[#allocation6 + $0x98] sm:$0xff]  }
 0x11b   :  { %1270 = vmatprep.subr.bf16.mxu1 %v2205_v34  ;;  %1921 = vmatprep.subr.bf16.mxu0 %v2206_v35  ;;  %v2259_v34 = vld [vmem:[#allocation6 + $0x88] sm:$0xff]   ;;  %v2260_v35 = vld [vmem:[#allocation6 + $0x80] sm:$0xff]  }
 0x11e   :  { %1271 = vmatpush1.bf16.msra.mxu1 %v2203_v36  ;;  %1922 = vmatpush3.bf16.msra.mxu0 %v2207_v37 }
 0x11f   :  { %1272 = vmatprep.subr.bf16.mxu1 %v2210_v40  ;;  %1923 = vmatprep.subr.bf16.mxu0 %v2211_v41  ;;  %v524_v41 = vrot.slane %v515_v39, %v96_v30 }
 0x122   :  { %1273 = vmatpush1.bf16.msra.mxu1 %v2208_v42  ;;  %1924 = vmatpush3.bf16.msra.mxu0 %v2212_v43  ;;  %v520_v42 = vrot.slane %v515_v39, %v92_v31 }
 0x123   :  { %1931 = vmatprep.subr.bf16.mxu1 %v2213_v45  ;;  %2003 = vmatprep.subr.bf16.mxu0 %v2335_v18 }
 0x125   :  { %1291 = vmatmul.mubr.bf16.vlgmr.msra.gmra.mxu1 %v354_v47  ;;  %1334 = vmatmul.mubr.bf16.vlgmr.msra.gmra.mxu0 %v2429_v2  ;;  %v2231_v2 = vld [vmem:[#allocation4 + $0x260] ss:$12 sps:$4 sm:$0xff]  }
 0x126   :  { %1932 = vmatpush3.bf16.msra.mxu1 %v2214_v46  ;;  %1374 = vmatprep.mubr.bf16.mxu1 %v2427_v62  ;;  %v2228_v62 = vld [vmem:[#allocation4 + $0x278] ss:$12 sps:$4 sm:$0xff]  }
 0x127   :  { %2004 = vmatpush3.bf16.msra.mxu0 %v2215_v48  ;;  %1933 = vmatprep.subr.bf16.mxu1 %v2216_v49 }
 0x128   :  { %2005 = vmatprep.subr.bf16.mxu0 %v2335_v18  ;;  %2019 = vmatprep.mubr.msk.bf16.mxu0 %vm2336_vm2, %v2335_v18 }
 0x12a   :  { %1934 = vmatpush3.bf16.msra.mxu1 %v2217_v50 }
 0x12b   :  { %2006 = vmatpush3.bf16.msra.mxu0 %v2218_v51  ;;  %1935 = vmatprep.subr.bf16.mxu1 %v2219_v52 }
 0x12c   :  { %2007 = vmatprep.subr.bf16.mxu0 %v2335_v18 }
 0x12e   :  { %1936 = vmatpush3.bf16.msra.mxu1 %v2220_v53 }
 0x12f   :  { %2008 = vmatpush3.bf16.msra.mxu0 %v2221_v54  ;;  %1937 = vmatprep.subr.bf16.mxu1 %v2222_v55 }
 0x130   :  { %2009 = vmatprep.subr.bf16.mxu0 %v2335_v18 }
 0x132   :  { %1938 = vmatpush3.bf16.msra.mxu1 %v2223_v56 }
 0x133   :  { %2010 = vmatpush3.bf16.msra.mxu0 %v2224_v57  ;;  %1939 = vmatprep.subr.bf16.mxu1 %v2225_v58 }
 0x134   :  { %2011 = vmatprep.subr.bf16.mxu0 %v2335_v18 }
 0x136   :  { %1940 = vmatpush3.bf16.msra.mxu1 %v2226_v59 }
 0x137   :  { %2012 = vmatpush3.bf16.msra.mxu0 %v2227_v61  ;;  %1941 = vmatprep.subr.bf16.mxu1 %v2228_v62 }
 0x138   :  { %2013 = vmatprep.subr.bf16.mxu0 %v2335_v18 }
 0x13a   :  { %1942 = vmatpush3.bf16.msra.mxu1 %v2229_v63 }
 0x13b   :  { %2014 = vmatpush3.bf16.msra.mxu0 %v2230_v1  ;;  %1943 = vmatprep.subr.bf16.mxu1 %v2231_v2 }
 0x13c   :  { %2015 = vmatprep.subr.bf16.mxu0 %v2335_v18 }
 0x13e   :  { %1944 = vmatpush3.bf16.msra.mxu1 %v2232_v3 }
 0x13f   :  { %2016 = vmatpush3.bf16.msra.mxu0 %v2233_v4  ;;  %1945 = vmatprep.subr.bf16.mxu1 %v2234_v5 }
 0x140   :  { %2017 = vmatprep.subr.bf16.mxu0 %v2335_v18 }
 0x142   :  { %1946 = vmatpush3.bf16.msra.mxu1 %v2235_v6  ;;  %v528_v6 = vrot.slane %v515_v39, %v100_v27 }
 0x143   :  { %2018 = vmatpush3.bf16.msra.mxu0 %v2236_v7  ;;  %1962 = vmatprep.subr.bf16.mxu1 %v2237_v8 }
 0x144   :  { %2023 = vmatprep.subr.bf16.mxu0 %v2335_v18 }
 0x145   :  { %1375 = vmatmul.mubr.bf16.vlgmr.msra.gmra.mxu1 %v2425_v60  ;;  %v2245_v60 = vld [vmem:[#allocation6 + $0x58] sm:$0xff]  }
 0x146   :  { %2020 = vmatmul.mubr.bf16.vlgmr.msra.gmra.mxu0 %v354_v47  ;;  %1963 = vmatpush3.bf16.msra.mxu1 %v2238_v9 }
 0x147   :  { %2039 = vmatprep.mubr.msk.bf16.mxu0 %vm2336_vm2, %v2335_v18  ;;  %1964 = vmatprep.subr.bf16.mxu1 %v2239_v10 }
 0x148   :  { %2024 = vmatpush3.bf16.msra.mxu0 %v2253_v23 }
 0x149   :  { %2025 = vmatprep.subr.bf16.mxu0 %v2335_v18 }
 0x14a   :  { %1965 = vmatpush3.bf16.msra.mxu1 %v2240_v11 }
 0x14b   :  { %1966 = vmatprep.subr.bf16.mxu1 %v2241_v12 }
 0x14c   :  { %2026 = vmatpush3.bf16.msra.mxu0 %v2254_v24 }
 0x14d   :  { %2027 = vmatprep.subr.bf16.mxu0 %v2335_v18 }
 0x14e   :  { %1967 = vmatpush3.bf16.msra.mxu1 %v2242_v13 }
 0x14f   :  { %1968 = vmatprep.subr.bf16.mxu1 %v2243_v14 }
 0x150   :  { %2028 = vmatpush3.bf16.msra.mxu0 %v2255_v25 }
 0x151   :  { %2029 = vmatprep.subr.bf16.mxu0 %v2335_v18 }
 0x152   :  { %1969 = vmatpush3.bf16.msra.mxu1 %v2244_v15 }
 0x153   :  { %1970 = vmatprep.subr.bf16.mxu1 %v2245_v60 }
 0x154   :  { %2030 = vmatpush3.bf16.msra.mxu0 %v2256_v28 }
 0x155   :  { %2031 = vmatprep.subr.bf16.mxu0 %v2335_v18 }
 0x156   :  { %1971 = vmatpush3.bf16.msra.mxu1 %v2246_v16 }
 0x157   :  { %1972 = vmatprep.subr.bf16.mxu1 %v2247_v17 }
 0x158   :  { %2032 = vmatpush3.bf16.msra.mxu0 %v2257_v32 }
 0x159   :  { %2033 = vmatprep.subr.bf16.mxu0 %v2335_v18 }
 0x15a   :  { %1973 = vmatpush3.bf16.msra.mxu1 %v2248_v19 }
 0x15b   :  { %1974 = vmatprep.subr.bf16.mxu1 %v2249_v20 }
 0x15c   :  { %2034 = vmatpush3.bf16.msra.mxu0 %v2258_v33 }
 0x15d   :  { %2035 = vmatprep.subr.bf16.mxu0 %v2335_v18 }
 0x15e   :  { %1975 = vmatpush3.bf16.msra.mxu1 %v2250_v21 }
 0x15f   :  { %1976 = vmatprep.subr.bf16.mxu1 %v2251_v0 }
 0x160   :  { %2036 = vmatpush3.bf16.msra.mxu0 %v2259_v34 }
 0x161   :  { %2037 = vmatprep.subr.bf16.mxu0 %v2335_v18 }
 0x162   :  { %1977 = vmatpush3.bf16.msra.mxu1 %v2252_v22 }
 0x164   :  { %2038 = vmatpush3.bf16.msra.mxu0 %v2260_v35 }
 0x1c5   :  { %v1206_v36 = vpop.f32.mrf.mxu1  ;;  %v1249_v38 = vpop.f32.mrf.mxu0 }
 0x1c6   :  { %v1207_v45 = vadd.f32 %v1206_v36, %v520_v42 }
 0x1c7   :  { %v1208_v37 = vpop.f32.mrf.mxu1  ;;  %v1251_v43 = vpop.f32.mrf.mxu0 }
 0x1c8   :  { %v1209_v29 = vadd.f32 %v1208_v37, %v524_v41  ;;  %v1250_v52 = vadd.f32 %v1249_v38, %v1207_v45  ;;  %v1871_v37 = vld [vmem:[%s2481_s6] ss:$0 sm:$0xff] }
 0x1c9   :  { %v1210_v40 = vpop.f32.mrf.mxu1  ;;  %v1253_v46 = vpop.f32.mrf.mxu0 }
 0x1ca   :  { %v1211_v18 = vadd.f32 %v1210_v40, %v520_v42  ;;  %v1252_v50 = vadd.f32 %v1251_v43, %v1209_v29 }
 0x1cb   :  { %v1212_v44 = vpop.f32.mrf.mxu1  ;;  %v1255_v53 = vpop.f32.mrf.mxu0 }
 0x1cc   :  { %v1213_v48 = vadd.f32 %v1212_v44, %v524_v41  ;;  %v1254_v51 = vadd.f32 %v1253_v46, %v1211_v18 }
 0x1ce   :  { %v1256_v55 = vadd.f32 %v1255_v53, %v1213_v48 }
 0x1e5   :  { %v1292_v47 = vpop.f32.mrf.mxu1  ;;  %v1925_v3 = vpop.f32.mrf.mxu0 }
 0x1e6   :  { %v1293_v57 = vadd.f32 %v1292_v47, %v1250_v52 }
 0x1e7   :  { %v1294_v49 = vpop.f32.mrf.mxu1  ;;  %v1926_v4 = vpop.f32.mrf.mxu0 }
 0x1e8   :  { %v1295_v56 = vadd.f32 %v1294_v49, %v1252_v50  ;;  %v1424_v63 = vmax.f32 %v1293_v57, 0.0  ;;  %v1927_v7 = vadd.f32 %v1926_v4, %v1925_v3 }
 0x1e9   :  { %v1296_v54 = vpop.f32.mrf.mxu1  ;;  %v1928_v5 = vpop.f32.mrf.mxu0 }
 0x1ea   :  { %v1297_v30 = vadd.f32 %v1296_v54, %v1254_v51  ;;  %v1425_v61 = vmax.f32 %v1295_v56, 0.0  ;;  %v1336_v12 = vadd.f32 %v1927_v7, %v528_v6 }
 0x1eb   :  { %v1298_v58 = vpop.f32.mrf.mxu1  ;;  %v1929_v8 = vpop.f32.mrf.mxu0 }
 0x1ec   :  { %v1299_v31 = vadd.f32 %v1298_v58, %v1256_v55  ;;  %v1427_v59 = vmax.f32 %v1297_v30, 0.0  ;;  %v1930_v13 = vadd.f32 %v1929_v8, %v1928_v5 }
 0x1ee   :  { %v1428_v62 = vmax.f32 %v1299_v31, 0.0  ;;  %v1430_v2 = vpack.c.bf16 %v1427_v59, %v1424_v63  ;;  %v1339_v20 = vadd.f32 %v1930_v13, %v528_v6 }
 0x1f0   :  { %v1431_v1 = vpack.c.bf16 %v1428_v62, %v1425_v61 }
 0x1f2   :  { %1664 = vmatprep.mubr.bf16.mxu1 %v1431_v1 }
 0x1f3   :  { %1665 = vmatmul.mubr.bf16.vlgmr.msra.gmra.mxu1 %v1430_v2 }
 0x205   :  { %v1947_v9 = vpop.f32.mrf.mxu1 }
 0x206   :  { %v1417_v10 = vpop.f32.mrf.mxu0 }
 0x207   :  { %v1948_v11 = vpop.f32.mrf.mxu1 }
 0x208   :  { %v1949_v14 = vadd.f32 %v1948_v11, %v1947_v9  ;;  %v2021_v15 = vpop.f32.mrf.mxu0 }
 0x209   :  { %v1950_v60 = vpop.f32.mrf.mxu1 }
 0x20a   :  { %v1377_v16 = vadd.f32 %v1949_v14, %v1336_v12  ;;  %v1420_v17 = vpop.f32.mrf.mxu0 }
 0x20b   :  { %v1951_v19 = vpop.f32.mrf.mxu1 }
 0x20c   :  { %v1952_v21 = vadd.f32 %v1951_v19, %v1950_v60  ;;  %v2022_v0 = vpop.f32.mrf.mxu0  ;;  %v1418_v22 = vadd.f32 %v1417_v10, %v1377_v16 }
 0x20e   :  { %v1380_v23 = vadd.f32 %v1952_v21, %v1339_v20  ;;  %v1426_v27 = vmax.f32 %v1418_v22, 0.0 }
 0x210   :  { %v1421_v26 = vadd.f32 %v1420_v17, %v1380_v23 }
 0x212   :  { %v1429_v24 = vmax.f32 %v1421_v26, 0.0 }
 0x214   :  { %v1432_v25 = vpack.c.bf16 %v1429_v24, %v1426_v27 }
 0x216   :  { %2040 = vmatmul.mubr.bf16.vlgmr.msra.gmra.mxu0 %v1432_v25 }
 0x2b3   :  { %v1978_v28 = vpop.f32.mrf.mxu1 }
 0x2b5   :  { %v1979_v32 = vpop.f32.mrf.mxu1 }
 0x2b6   :  { %v1980_v35 = vadd.f32 %v1979_v32, %v1978_v28 }
 0x2b7   :  { %v1981_v33 = vpop.f32.mrf.mxu1 }
 0x2b8   :  { %v1667_v40 = vadd.f32 %v1980_v35, %v1871_v37 }
 0x2b9   :  { %v1982_v34 = vpop.f32.mrf.mxu1 }
 0x2ba   :  { %v1983_v36 = vadd.f32 %v1982_v34, %v1981_v33 }
 0x2bc   :  { %v1670_v41 = vadd.f32 %v1983_v36, %v1871_v37 }
 0x2d6   :  { %v1707_v38 = vpop.f32.mrf.mxu0 }
 0x2d7   :  { %v1708_v43 = vadd.f32 %v1707_v38, %v1667_v40 }
 0x2d8   :  { %v2041_v39 = vpop.f32.mrf.mxu0 }
 0x2da   :  { %v1710_v42 = vpop.f32.mrf.mxu0 }
 0x2db   :  { %v1711_v44 = vadd.f32 %v1710_v42, %v1670_v41 }
 0x2dc   :  { %v2042_v29 = vpop.f32.mrf.mxu0 }
 0x2dd   :  { %v1903_v18 = vpack.c.bf16 %v1711_v44, %v1708_v43 }
 0x2df   :  { %1904 = vst [vmem:[%s2482_s7] sm:$0xff] %v1903_v18  }
 0x2e0   :  { %1728 = vsyncpa [#allocation3], 1 }
 0x2e1   :  { %1729 = vsyncpa [#allocation5], 1 }

</bundles_post_ra>
